<compile_context>
chip_gen: v5e
topology: v5e:2x2
jax: 0.10.0
libtpu: 0.0.40
codegen_flags: <defaults>
</compile_context>

<pallas_src>
import functools

import jax
import jax.numpy as jnp
from jax.experimental import pallas as pl
from jax.experimental.pallas import tpu as pltpu

NEG_SLOPE = 0.01  # torch default for nn.LeakyReLU


def _leaky_relu(x):
    return jnp.where(x > 0, x, NEG_SLOPE * x)


def _round_up(a, b):
    return (a + b - 1) // b * b


def mlp_kernel(x_ref, w1_ref, b1_ref, w2_ref, b2_ref, w3_ref, b3_ref, o_ref):
    """One grid step = one batch tile; w1/w2/w3/biases are VMEM-resident."""
    # x arrives in its native dtype; cast to bf16 on the VPU (hidden under DMA).
    x = x_ref[...].astype(jnp.bfloat16)

    h1 = jnp.dot(x, w1_ref[...], preferred_element_type=jnp.float32) + b1_ref[...]
    h1 = _leaky_relu(h1)

    h2 = jnp.dot(h1.astype(jnp.bfloat16), w2_ref[...],
                 preferred_element_type=jnp.float32) + b2_ref[...]
    h2 = _leaky_relu(h2)

    # Dropout (p=0.0 / eval) -> identity.
    out = jnp.dot(h2.astype(jnp.bfloat16), w3_ref[...],
                  preferred_element_type=jnp.float32) + b3_ref[...]
    o_ref[...] = out.astype(o_ref.dtype)


def prepare_params(w1, b1, w2, b2, w3, b3):
    """One-time weight prep (hoisted out of the per-call path).

    Pads the tiny trailing dims (H2 64->128, OUT 2->128) for lane-dense MXU
    tiles / stores and casts matmul operands to bf16.  Biases stay f32.
    Padded rows/cols are zero, so results are unchanged.
    """
    H1, H2, OUT = w1.shape[1], w2.shape[1], w3.shape[1]
    H1p, H2p, OUTp = _round_up(H1, 128), _round_up(H2, 128), _round_up(OUT, 128)
    f32, bf16 = jnp.float32, jnp.bfloat16

    def row(b):
        return jnp.reshape(b, (1, -1)).astype(f32)

    w1p = jnp.pad(w1, ((0, 0), (0, H1p - H1))).astype(bf16)          # (D, H1p)
    b1p = jnp.pad(row(b1), ((0, 0), (0, H1p - H1)))
    w2p = jnp.pad(w2, ((0, H1p - H1), (0, H2p - H2))).astype(bf16)   # (H1p, H2p)
    b2p = jnp.pad(row(b2), ((0, 0), (0, H2p - H2)))
    w3p = jnp.pad(w3, ((0, H2p - H2), (0, OUTp - OUT))).astype(bf16)  # (H2p, OUTp)
    b3p = jnp.pad(row(b3), ((0, 0), (0, OUTp - OUT)))
    return (w1p, b1p, w2p, b2p, w3p, b3p), OUT


@functools.partial(jax.jit, static_argnames=("out_dim", "block_b"))
def mlp_forward(x, w1p, b1p, w2p, b2p, w3p, b3p, *, out_dim, block_b=256):
    B, D = x.shape
    H1p = w1p.shape[1]
    H2p = w2p.shape[1]
    OUTp = w3p.shape[1]

    # --- batch tile selection -------------------------------------------------
    # 128-aligned; >=2 tiles when B >= 256 so both v7x TensorCores get work;
    # for small B shrink to round_up(B, 8) so no padded-batch work is done.
    if B >= 256:
        block_b = min(block_b, _round_up(-(-B // 2), 128))
    else:
        block_b = min(block_b, _round_up(B, 8))
    block_b = max(block_b, 8)

    x_bytes = jnp.dtype(x.dtype).itemsize
    # Keep the double-buffered x tile under ~24 MB (v7x 64 MiB/TC headroom).
    while block_b > 128 and 2 * block_b * D * x_bytes > 24 * 1024 * 1024:
        block_b //= 2

    n_b = -(-B // block_b)

    # --- VMEM budget from the actual config ----------------------------------
    vmem_need = (
        2 * block_b * D * x_bytes                  # x tiles (double-buffered)
        + 2 * D * H1p * 2                          # resident w1 (bf16, 2 buffers alloc'd)
        + 2 * (H1p * H2p + H2p * OUTp) * 2         # w2, w3
        + 2 * (H1p + H2p + OUTp) * 4               # biases
        + 2 * block_b * OUTp * 4                   # out tiles
        + block_b * (2 * H1p + 2 * H2p + OUTp) * 4  # in-kernel temporaries
    )
    vmem_limit = int(min(max(int(1.25 * vmem_need), 32 * 1024 * 1024),
                         48 * 1024 * 1024))

    # Advisory cost: x read once, each weight read once, lane-dense f32 output.
    cost = pl.CostEstimate(
        flops=2 * n_b * block_b * (D * H1p + H1p * H2p + H2p * OUTp),
        transcendentals=0,
        bytes_accessed=(B * D * x_bytes
                        + (D * H1p + H1p * H2p + H2p * OUTp) * 2
                        + (H1p + H2p + OUTp) * 4
                        + B * OUTp * 4),
    )

    out_padded = pl.pallas_call(
        mlp_kernel,
        out_shape=jax.ShapeDtypeStruct((B, OUTp), jnp.float32),
        grid_spec=pltpu.PrefetchScalarGridSpec(
            num_scalar_prefetch=0,
            grid=(n_b,),
            in_specs=[
                pl.BlockSpec((block_b, D), lambda i: (i, 0)),   # x: streamed per tile
                pl.BlockSpec((D, H1p), lambda i: (0, 0)),       # w1: VMEM-resident
                pl.BlockSpec((1, H1p), lambda i: (0, 0)),       # b1
                pl.BlockSpec((H1p, H2p), lambda i: (0, 0)),     # w2
                pl.BlockSpec((1, H2p), lambda i: (0, 0)),       # b2
                pl.BlockSpec((H2p, OUTp), lambda i: (0, 0)),    # w3
                pl.BlockSpec((1, OUTp), lambda i: (0, 0)),      # b3
            ],
            out_specs=pl.BlockSpec((block_b, OUTp), lambda i: (i, 0)),
        ),
        compiler_params=pltpu.CompilerParams(
            dimension_semantics=("parallel",),
            vmem_limit_bytes=vmem_limit,
        ),
        cost_estimate=cost,
    )(x, w1p, b1p, w2p, b2p, w3p, b3p)

    return out_padded[:, :out_dim]


def init_params(key, in_dim, h1=256, h2=64, out_dim=2):
    """Deterministic init mimicking torch.nn.Linear's uniform(-1/sqrt(fan_in), +)."""
    ks = jax.random.split(key, 6)

    def lin(kw, kb, fan_in, fan_out):
        bound = 1.0 / jnp.sqrt(fan_in)
        w = jax.random.uniform(kw, (fan_in, fan_out), jnp.float32, -bound, bound)
        b = jax.random.uniform(kb, (1, fan_out), jnp.float32, -bound, bound)
        return w, b

    w1, b1 = lin(ks[0], ks[1], in_dim, h1)
    w2, b2 = lin(ks[2], ks[3], h1, h2)
    w3, b3 = lin(ks[4], ks[5], h2, out_dim)
    return w1, b1, w2, b2, w3, b3


def reference_forward(x, w1, b1, w2, b2, w3, b3):
    """Mirrors the kernel's numerics: bf16 MXU operands, f32 accumulation."""
    bf16 = jnp.bfloat16
    h1 = _leaky_relu(jnp.dot(x.astype(bf16), w1.astype(bf16),
                             preferred_element_type=jnp.float32) + b1)
    h2 = _leaky_relu(jnp.dot(h1.astype(bf16), w2.astype(bf16),
                             preferred_element_type=jnp.float32) + b2)
    return jnp.dot(h2.astype(bf16), w3.astype(bf16),
                   preferred_element_type=jnp.float32) + b3


if __name__ == "__main__":
    key = jax.random.PRNGKey(0)
    k_x, k_p = jax.random.split(key)

    # Small, module-consistent shapes: batch=16, in_dim=640 (stands in for
    # 10319).  Exercises the resident-w1 path, the f32->bf16 in-kernel cast,
    # the small-batch tile shrink (block_b -> 16) and the lane-dense padded
    # (OUT 2 -> 128) output store.
    B, IN_DIM = 16, 640
    x = jax.random.normal(k_x, (B, IN_DIM), jnp.float32)
    params = init_params(k_p, IN_DIM)

    prepped, out_dim = prepare_params(*params)          # one-time weight prep
    out = jax.block_until_ready(mlp_forward(x, *prepped, out_dim=out_dim))

    ref = reference_forward(x, *params)
    assert out.shape == (B, 2), out.shape
    max_err = float(jnp.max(jnp.abs(out - ref)))
    assert jnp.allclose(out, ref, atol=2e-2, rtol=2e-2), \
        f"mismatch vs ref, max|diff|={max_err}"

    print("KERNEL_OK")
</pallas_src>

<mosaic_0001>
module attributes {stable_mosaic.version = 11 : i64} {
  func.func @mlp_kernel(%arg0: i32, %arg1: memref<16x640xf32, #tpu.memory_space<vmem>>, %arg2: memref<640x256xbf16, #tpu.memory_space<vmem>>, %arg3: memref<1x256xf32, #tpu.memory_space<vmem>>, %arg4: memref<256x128xbf16, #tpu.memory_space<vmem>>, %arg5: memref<1x128xf32, #tpu.memory_space<vmem>>, %arg6: memref<128x128xbf16, #tpu.memory_space<vmem>>, %arg7: memref<1x128xf32, #tpu.memory_space<vmem>>, %arg8: memref<16x128xf32, #tpu.memory_space<vmem>>) attributes {dimension_semantics = [#tpu.dimension_semantics<parallel>], iteration_bounds = array<i64: 1>, scalar_prefetch = 0 : i64, scratch_operands = 0 : i64, tpu.core_type = #tpu.core_type<tc>, window_params = [{transform_indices = @transform_0, window_bounds = array<i64: 16, 640>}, {pipeline_mode = #tpu.pipeline_mode<synchronous>, transform_indices = @transform_1, window_bounds = array<i64: 640, 256>}, {pipeline_mode = #tpu.pipeline_mode<synchronous>, transform_indices = @transform_2, window_bounds = array<i64: 1, 256>}, {pipeline_mode = #tpu.pipeline_mode<synchronous>, transform_indices = @transform_3, window_bounds = array<i64: 256, 128>}, {pipeline_mode = #tpu.pipeline_mode<synchronous>, transform_indices = @transform_4, window_bounds = array<i64: 1, 128>}, {pipeline_mode = #tpu.pipeline_mode<synchronous>, transform_indices = @transform_5, window_bounds = array<i64: 128, 128>}, {pipeline_mode = #tpu.pipeline_mode<synchronous>, transform_indices = @transform_6, window_bounds = array<i64: 1, 128>}, {transform_indices = @transform_7, window_bounds = array<i64: 16, 128>}]} {
    %c0 = arith.constant 0 : index
    %c0_0 = arith.constant 0 : index
    %0 = vector.load %arg1[%c0, %c0_0] : memref<16x640xf32, #tpu.memory_space<vmem>>, vector<16x640xf32>
    %1 = arith.truncf %0 : vector<16x640xf32> to vector<16x640xbf16>
    %c0_1 = arith.constant 0 : index
    %c0_2 = arith.constant 0 : index
    %2 = vector.load %arg2[%c0_1, %c0_2] : memref<640x256xbf16, #tpu.memory_space<vmem>>, vector<640x256xbf16>
    %cst = arith.constant dense<0.000000e+00> : vector<16x256xf32>
    %3 = tpu.matmul %1, %2, %cst {dimension_numbers = #tpu.dot_dimension_numbers<[1], [0], [0], [1], [0, 0, 1, 1], [], []>} : vector<16x640xbf16>, vector<640x256xbf16>, vector<16x256xf32> -> vector<16x256xf32>
    %c0_3 = arith.constant 0 : index
    %c0_4 = arith.constant 0 : index
    %4 = vector.load %arg3[%c0_3, %c0_4] : memref<1x256xf32, #tpu.memory_space<vmem>>, vector<1x256xf32>
    %5 = vector.broadcast %4 : vector<1x256xf32> to vector<16x256xf32>
    %6 = arith.addf %3, %5 : vector<16x256xf32>
    %cst_5 = arith.constant 0.000000e+00 : f32
    %7 = vector.broadcast %cst_5 : f32 to vector<16x256xf32>
    %8 = arith.cmpf ogt, %6, %7 : vector<16x256xf32>
    %cst_6 = arith.constant 0.00999999977 : f32
    %9 = vector.broadcast %cst_6 : f32 to vector<16x256xf32>
    %10 = arith.mulf %9, %6 : vector<16x256xf32>
    %11 = arith.select %8, %6, %10 : vector<16x256xi1>, vector<16x256xf32>
    %12 = arith.truncf %11 : vector<16x256xf32> to vector<16x256xbf16>
    %c0_7 = arith.constant 0 : index
    %c0_8 = arith.constant 0 : index
    %13 = vector.load %arg4[%c0_7, %c0_8] : memref<256x128xbf16, #tpu.memory_space<vmem>>, vector<256x128xbf16>
    %cst_9 = arith.constant dense<0.000000e+00> : vector<16x128xf32>
    %14 = tpu.matmul %12, %13, %cst_9 {dimension_numbers = #tpu.dot_dimension_numbers<[1], [0], [0], [1], [0, 0, 1, 1], [], []>} : vector<16x256xbf16>, vector<256x128xbf16>, vector<16x128xf32> -> vector<16x128xf32>
    %c0_10 = arith.constant 0 : index
    %c0_11 = arith.constant 0 : index
    %15 = vector.load %arg5[%c0_10, %c0_11] : memref<1x128xf32, #tpu.memory_space<vmem>>, vector<1x128xf32>
    %16 = vector.broadcast %15 : vector<1x128xf32> to vector<16x128xf32>
    %17 = arith.addf %14, %16 : vector<16x128xf32>
    %cst_12 = arith.constant 0.000000e+00 : f32
    %18 = vector.broadcast %cst_12 : f32 to vector<16x128xf32>
    %19 = arith.cmpf ogt, %17, %18 : vector<16x128xf32>
    %cst_13 = arith.constant 0.00999999977 : f32
    %20 = vector.broadcast %cst_13 : f32 to vector<16x128xf32>
    %21 = arith.mulf %20, %17 : vector<16x128xf32>
    %22 = arith.select %19, %17, %21 : vector<16x128xi1>, vector<16x128xf32>
    %23 = arith.truncf %22 : vector<16x128xf32> to vector<16x128xbf16>
    %c0_14 = arith.constant 0 : index
    %c0_15 = arith.constant 0 : index
    %24 = vector.load %arg6[%c0_14, %c0_15] : memref<128x128xbf16, #tpu.memory_space<vmem>>, vector<128x128xbf16>
    %cst_16 = arith.constant dense<0.000000e+00> : vector<16x128xf32>
    %25 = tpu.matmul %23, %24, %cst_16 {dimension_numbers = #tpu.dot_dimension_numbers<[1], [0], [0], [1], [0, 0, 1, 1], [], []>} : vector<16x128xbf16>, vector<128x128xbf16>, vector<16x128xf32> -> vector<16x128xf32>
    %c0_17 = arith.constant 0 : index
    %c0_18 = arith.constant 0 : index
    %26 = vector.load %arg7[%c0_17, %c0_18] : memref<1x128xf32, #tpu.memory_space<vmem>>, vector<1x128xf32>
    %27 = vector.broadcast %26 : vector<1x128xf32> to vector<16x128xf32>
    %28 = arith.addf %25, %27 : vector<16x128xf32>
    %c0_19 = arith.constant 0 : index
    %c0_20 = arith.constant 0 : index
    %29 = vector.load %arg8[%c0_19, %c0_20] : memref<16x128xf32, #tpu.memory_space<vmem>>, vector<16x128xf32>
    tpu.vector_store %arg8[%c0_19, %c0_20], %28 {strides = array<i32>} : memref<16x128xf32, #tpu.memory_space<vmem>>, vector<16x128xf32>,
    return
  }
  func.func @transform_0(%arg0: i32) -> (i32, i32) {
    %c0_i32 = arith.constant 0 : i32
    %c0_i32_0 = arith.constant 0 : i32
    return %arg0, %c0_i32 : i32, i32
  }
  func.func @transform_1(%arg0: i32) -> (i32, i32) {
    %c0_i32 = arith.constant 0 : i32
    %c0_i32_0 = arith.constant 0 : i32
    %c0_i32_1 = arith.constant 0 : i32
    return %c0_i32, %c0_i32_0 : i32, i32
  }
  func.func @transform_2(%arg0: i32) -> (i32, i32) {
    %c0_i32 = arith.constant 0 : i32
    %c0_i32_0 = arith.constant 0 : i32
    %c0_i32_1 = arith.constant 0 : i32
    return %c0_i32, %c0_i32_0 : i32, i32
  }
  func.func @transform_3(%arg0: i32) -> (i32, i32) {
    %c0_i32 = arith.constant 0 : i32
    %c0_i32_0 = arith.constant 0 : i32
    %c0_i32_1 = arith.constant 0 : i32
    return %c0_i32, %c0_i32_0 : i32, i32
  }
  func.func @transform_4(%arg0: i32) -> (i32, i32) {
    %c0_i32 = arith.constant 0 : i32
    %c0_i32_0 = arith.constant 0 : i32
    %c0_i32_1 = arith.constant 0 : i32
    return %c0_i32, %c0_i32_0 : i32, i32
  }
  func.func @transform_5(%arg0: i32) -> (i32, i32) {
    %c0_i32 = arith.constant 0 : i32
    %c0_i32_0 = arith.constant 0 : i32
    %c0_i32_1 = arith.constant 0 : i32
    return %c0_i32, %c0_i32_0 : i32, i32
  }
  func.func @transform_6(%arg0: i32) -> (i32, i32) {
    %c0_i32 = arith.constant 0 : i32
    %c0_i32_0 = arith.constant 0 : i32
    %c0_i32_1 = arith.constant 0 : i32
    return %c0_i32, %c0_i32_0 : i32, i32
  }
  func.func @transform_7(%arg0: i32) -> (i32, i32) {
    %c0_i32 = arith.constant 0 : i32
    %c0_i32_0 = arith.constant 0 : i32
    return %arg0, %c0_i32 : i32, i32
  }
}

</mosaic_0001>

<bundles_post_ra>
// kernel: mlp_forward.1
= control target key start
LH: loop header
LB: loop body
LE: loop exit
PB: predicated region body
PF: predicated region fallthrough
CT: control target
= control target key end

     0   :  { %12 = vsyncpa [#allocation3], 0  ;;  %s1772_s0 = inlined_call_operand.hbm [shape: f32[16,640], index: 0, kind: input, shape index: {}]   ;;  %s1773_s1 = inlined_call_operand.hbm [shape: bf16[640,256], index: 1, kind: input, shape index: {}]   ;;  %s1774_s2 = inlined_call_operand.hbm [shape: f32[1,256], index: 2, kind: input, shape index: {}]   ;;  %s1775_s3 = inlined_call_operand.hbm [shape: bf16[256,128], index: 3, kind: input, shape index: {}]   ;;  %s1776_s4 = inlined_call_operand.vmem [shape: f32[1,128], index: 4, kind: input, shape index: {}]   ;;  %s1777_s5 = inlined_call_operand.hbm [shape: bf16[128,128], index: 5, kind: input, shape index: {}]   ;;  %s1778_s6 = inlined_call_operand.vmem [shape: f32[1,128], index: 6, kind: input, shape index: {}]   ;;  %s1779_s7 = inlined_call_operand.vmem [shape: f32[16,128], index: 7, kind: output, shape index: {}]  }
   0x1   :  { %13 = vsyncpa [#allocation5], 0  ;;  %s32_s26 = sshll.u32 %s1773_s1, 4  ;;  %s33_s26 = int_to_ptr.hbm [resolvable:$true] %s32_s26 }
   0x2   :  { %14 = vsyncpa [#allocation8], 0  ;;  %s1674_s27 = smov [#allocation4]   ;;  %s56_s8 = sshll.u32 %s1775_s3, 4  ;;  %s57_s8 = int_to_ptr.hbm [resolvable:$true] %s56_s8 }
   0x3   :  { %s34_s28 = sshll.u32 %s1674_s27, 4  ;;  %s1675_s9 = smov 128   ;;  %s35_s28 = int_to_ptr.vmem [resolvable:$true] %s34_s28 }
   0x4   :  { %s1676_s10 = smov 8   ;;  %s1677_s11 = smov [#allocation7]  }
   0x5   :  { %40 = dma.hbm_to_vmem [thread:$0]  %s33_s26, 10240, %s35_s28, [#allocation5], %s1675_s9, %s1675_s9, %s1676_s10  }
   0x6   :  { %s58_s12 = sshll.u32 %s1677_s11, 4  ;;  %s1678_s13 = smov 64   ;;  %s59_s12 = int_to_ptr.vmem [resolvable:$true] %s58_s12 }
   0x7   :  { %s1679_s14 = smov 4   ;;  %s19_s16 = sshll.u32 %s1772_s0, 4  ;;  %s20_s16 = int_to_ptr.hbm [resolvable:$true] %s19_s16 }
   0x8   :  { %64 = dma.hbm_to_vmem [thread:$0]  %s57_s8, 2048, %s59_s12, [#allocation8], %s1678_s13, %s1678_s13, %s1679_s14  }
   0x9   :  { %s1680_s17 = smov [#allocation2]   ;;  %s46_s20 = sshll.u32 %s1774_s2, 4  ;;  %s47_s20 = int_to_ptr.hbm [resolvable:$true] %s46_s20 }
   0xa   :  { %s21_s18 = sshll.u32 %s1680_s17, 4  ;;  %s1681_s21 = smov 640   ;;  %s22_s18 = int_to_ptr.vmem [resolvable:$true] %s21_s18 }
   0xb   :  { %s1682_s22 = smov 40   ;;  %s1683_s23 = smov [#allocation6]  }
   0xc   :  { %27 = dma.hbm_to_vmem [thread:$0]  %s20_s16, 1280, %s22_s18, [#allocation3], %s1681_s21, %s1681_s21, %s1682_s22  }
   0xd   :  { %s48_s24 = sshll.u32 %s1683_s23, 4  ;;  %s71_s27 = sshll.u32 %s1777_s5, 4  ;;  %s49_s24 = int_to_ptr.vmem [resolvable:$true] %s48_s24  ;;  %s72_s27 = int_to_ptr.hbm [resolvable:$true] %s71_s27 }
   0xe   :  { %51 = dma.hbm_to_vmem [thread:$0]  %s47_s20, 32, %s49_s24, [#allocation5]  }
   0xf   :  { %s1684_s0 = smov [#allocation9]  }
  0x10   :  { %s73_s28 = sshll.u32 %s1684_s0, 4  ;;  %s74_s28 = int_to_ptr.vmem [resolvable:$true] %s73_s28 }
  0x11   :  { %79 = dma.hbm_to_vmem [thread:$0]  %s72_s27, 1024, %s74_s28, [#allocation8], %s1678_s13, %s1678_s13, %s1679_s14  }
  0x12   :  { %1668 = dma.done.wait [#allocation3], 1280  }
  0x13   :  { %1669 = vsyncadd [#allocation3], 4294966016 }
  0x14   :  { %1670 = dma.done.wait [#allocation5], 10272  }
  0x15   :  { %1671 = vsyncadd [#allocation5], 4294957024 }
  0x16   :  { %1672 = dma.done.wait [#allocation8], 3072  }
  0x17   :  { %1673 = vsyncadd [#allocation8], 4294964224  ;;  %v1073_v0 = vld [vmem:[#allocation4 + $0x70] sm:$0xf]  ;;  %v1446_v1 = vld [vmem:[#allocation4 + $0x74] sm:$0xf0] }
  0x18   :  { %v1137_v2 = vld [vmem:[#allocation4 + $0xf0] sm:$0xf]  ;;  %v1074_v3 = vor.u32 %v1446_v1, %v1073_v0  ;;  %v1462_v4 = vld [vmem:[#allocation4 + $0xf4] sm:$0xf0]  ;;  %v1065_v9 = vld [vmem:[#allocation4 + $0x60] sm:$0xf] }
  0x19   :  { %v1201_v5 = vld [vmem:[#allocation4 + $0x170] sm:$0xf]  ;;  %v1478_v6 = vld [vmem:[#allocation4 + $0x174] sm:$0xf0]  ;;  %v1138_v7 = vor.u32 %v1462_v4, %v1137_v2  ;;  %v1444_v10 = vld [vmem:[#allocation4 + $0x64] sm:$0xf0] }
  0x1a   :  { %v1202_v8 = vor.u32 %v1478_v6, %v1201_v5  ;;  %v1129_v11 = vld [vmem:[#allocation4 + $0xe0] sm:$0xf]  ;;  %603 = vmatpush.bf16.msra.mxu0 %v1074_v3  ;;  %v1066_v12 = vor.u32 %v1444_v10, %v1065_v9  ;;  %v1460_v13 = vld [vmem:[#allocation4 + $0xe4] sm:$0xf0]  ;;  %v1265_v14 = vld [vmem:[#allocation4 + $0x1f0] sm:$0xf] }
  0x1b   :  { %v1494_v15 = vld [vmem:[#allocation4 + $0x1f4] sm:$0xf0]  ;;  %617 = vmatpush.bf16.msra.mxu1 %v1138_v7  ;;  %v1130_v16 = vor.u32 %v1460_v13, %v1129_v11  ;;  %v1193_v18 = vld [vmem:[#allocation4 + $0x160] sm:$0xf]  ;;  %v1476_v19 = vld [vmem:[#allocation4 + $0x164] sm:$0xf0] }
  0x1c   :  { %631 = vmatpush.bf16.msra.mxu2 %v1202_v8  ;;  %v1266_v17 = vor.u32 %v1494_v15, %v1265_v14  ;;  %v1057_v20 = vld [vmem:[#allocation4 + $0x50] sm:$0xf]  ;;  %v1194_v21 = vor.u32 %v1476_v19, %v1193_v18  ;;  %v1442_v22 = vld [vmem:[#allocation4 + $0x54] sm:$0xf0]  ;;  %v1257_v25 = vld [vmem:[#allocation4 + $0x1e0] sm:$0xf] }
  0x1d   :  { %v1121_v23 = vld [vmem:[#allocation4 + $0xd0] sm:$0xf]  ;;  %v1458_v24 = vld [vmem:[#allocation4 + $0xd4] sm:$0xf0]  ;;  %v1492_v26 = vld [vmem:[#allocation4 + $0x1e4] sm:$0xf0]  ;;  %v1058_v28 = vor.u32 %v1442_v22, %v1057_v20 }
  0x1e   :  { %645 = vmatpush.bf16.msra.mxu3 %v1266_v17  ;;  %v1185_v27 = vld [vmem:[#allocation4 + $0x150] sm:$0xf]  ;;  %604 = vmatpush.bf16.msra.mxu0 %v1066_v12  ;;  %v1258_v29 = vor.u32 %v1492_v26, %v1257_v25  ;;  %v1474_v30 = vld [vmem:[#allocation4 + $0x154] sm:$0xf0]  ;;  %v1049_v31 = vld [vmem:[#allocation4 + $0x40] sm:$0xf]  ;;  %v1122_v33 = vor.u32 %v1458_v24, %v1121_v23 }
  0x1f   :  { %v1440_v32 = vld [vmem:[#allocation4 + $0x44] sm:$0xf0]  ;;  %618 = vmatpush.bf16.msra.mxu1 %v1130_v16  ;;  %v1186_v34 = vor.u32 %v1474_v30, %v1185_v27  ;;  %v1113_v35 = vld [vmem:[#allocation4 + $0xc0] sm:$0xf]  ;;  %v1249_v37 = vld [vmem:[#allocation4 + $0x1d0] sm:$0xf] }
  0x20   :  { %632 = vmatpush.bf16.msra.mxu2 %v1194_v21  ;;  %v1456_v36 = vld [vmem:[#allocation4 + $0xc4] sm:$0xf0]  ;;  %v1490_v38 = vld [vmem:[#allocation4 + $0x1d4] sm:$0xf0]  ;;  %v1177_v39 = vld [vmem:[#allocation4 + $0x140] sm:$0xf]  ;;  %v1050_v42 = vor.u32 %v1440_v32, %v1049_v31 }
  0x21   :  { %v1472_v40 = vld [vmem:[#allocation4 + $0x144] sm:$0xf0]  ;;  %v1250_v41 = vor.u32 %v1490_v38, %v1249_v37  ;;  %v1241_v43 = vld [vmem:[#allocation4 + $0x1c0] sm:$0xf]  ;;  %v1114_v45 = vor.u32 %v1456_v36, %v1113_v35  ;;  %v1041_v47 = vld [vmem:[#allocation4 + $0x30] sm:$0xf] }
  0x22   :  { %646 = vmatpush.bf16.msra.mxu3 %v1258_v29  ;;  %605 = vmatpush.bf16.msra.mxu0 %v1058_v28  ;;  %v1488_v44 = vld [vmem:[#allocation4 + $0x1c4] sm:$0xf0]  ;;  %v1178_v46 = vor.u32 %v1472_v40, %v1177_v39  ;;  %v1438_v48 = vld [vmem:[#allocation4 + $0x34] sm:$0xf0]  ;;  %v1105_v49 = vld [vmem:[#allocation4 + $0xb0] sm:$0xf] }
  0x23   :  { %619 = vmatpush.bf16.msra.mxu1 %v1122_v33  ;;  %v1454_v50 = vld [vmem:[#allocation4 + $0xb4] sm:$0xf0]  ;;  %v1169_v51 = vld [vmem:[#allocation4 + $0x130] sm:$0xf]  ;;  %v1242_v53 = vor.u32 %v1488_v44, %v1241_v43  ;;  %v1042_v54 = vor.u32 %v1438_v48, %v1041_v47  ;;  %v1033_v59 = vld [vmem:[#allocation4 + $0x20] sm:$0xf] }
  0x24   :  { %633 = vmatpush.bf16.msra.mxu2 %v1186_v34  ;;  %v1470_v52 = vld [vmem:[#allocation4 + $0x134] sm:$0xf0]  ;;  %v1233_v55 = vld [vmem:[#allocation4 + $0x1b0] sm:$0xf]  ;;  %v1106_v57 = vor.u32 %v1454_v50, %v1105_v49  ;;  %v1436_v60 = vld [vmem:[#allocation4 + $0x24] sm:$0xf0] }
  0x25   :  { %v1486_v56 = vld [vmem:[#allocation4 + $0x1b4] sm:$0xf0]  ;;  %v1170_v58 = vor.u32 %v1470_v52, %v1169_v51  ;;  %v1097_v61 = vld [vmem:[#allocation4 + $0xa0] sm:$0xf]  ;;  %v1452_v62 = vld [vmem:[#allocation4 + $0xa4] sm:$0xf0]  ;;  %v1034_v2 = vor.u32 %v1436_v60, %v1033_v59 }
  0x26   :  { %647 = vmatpush.bf16.msra.mxu3 %v1250_v41  ;;  %606 = vmatpush.bf16.msra.mxu0 %v1050_v42  ;;  %v1161_v63 = vld [vmem:[#allocation4 + $0x120] sm:$0xf]  ;;  %v1468_v0 = vld [vmem:[#allocation4 + $0x124] sm:$0xf0]  ;;  %v1234_v1 = vor.u32 %v1486_v56, %v1233_v55  ;;  %v1098_v5 = vor.u32 %v1452_v62, %v1097_v61  ;;  %v1025_v7 = vld [vmem:[#allocation4 + $0x10] sm:$0xf] }
  0x27   :  { %620 = vmatpush.bf16.msra.mxu1 %v1114_v45  ;;  %v1225_v3 = vld [vmem:[#allocation4 + $0x1a0] sm:$0xf]  ;;  %v1484_v4 = vld [vmem:[#allocation4 + $0x1a4] sm:$0xf0]  ;;  %v1162_v6 = vor.u32 %v1468_v0, %v1161_v63  ;;  %v1434_v8 = vld [vmem:[#allocation4 + $0x14] sm:$0xf0] }
  0x28   :  { %634 = vmatpush.bf16.msra.mxu2 %v1178_v46  ;;  %v1089_v9 = vld [vmem:[#allocation4 + $0x90] sm:$0xf]  ;;  %v1450_v10 = vld [vmem:[#allocation4 + $0x94] sm:$0xf0]  ;;  %v1226_v13 = vor.u32 %v1484_v4, %v1225_v3  ;;  %v1017_v14 = vld [vmem:[#allocation4] sm:$0xf]  ;;  %v1026_v15 = vor.u32 %v1434_v8, %v1025_v7 }
  0x29   :  { %v1153_v11 = vld [vmem:[#allocation4 + $0x110] sm:$0xf]  ;;  %v1466_v12 = vld [vmem:[#allocation4 + $0x114] sm:$0xf0]  ;;  %v1432_v16 = vld [vmem:[#allocation4 + $0x4] sm:$0xf0]  ;;  %v1090_v19 = vor.u32 %v1450_v10, %v1089_v9 }
  0x2a   :  { %648 = vmatpush.bf16.msra.mxu3 %v1242_v53  ;;  %607 = vmatpush.bf16.msra.mxu0 %v1042_v54  ;;  %v1217_v17 = vld [vmem:[#allocation4 + $0x190] sm:$0xf]  ;;  %v1482_v18 = vld [vmem:[#allocation4 + $0x194] sm:$0xf0]  ;;  %v1154_v20 = vor.u32 %v1466_v12, %v1153_v11  ;;  %v1081_v21 = vld [vmem:[#allocation4 + $0x80] sm:$0xf]  ;;  %v1018_v31 = vor.u32 %v1432_v16, %v1017_v14 }
  0x2b   :  { %621 = vmatpush.bf16.msra.mxu1 %v1106_v57  ;;  %v1448_v22 = vld [vmem:[#allocation4 + $0x84] sm:$0xf0]  ;;  %v1329_v23 = vld [vmem:[#allocation4 + $0x270] sm:$0xf]  ;;  %v1510_v24 = vld [vmem:[#allocation4 + $0x274] sm:$0xf0]  ;;  %v1218_v27 = vor.u32 %v1482_v18, %v1217_v17 }
  0x2c   :  { %635 = vmatpush.bf16.msra.mxu2 %v1170_v58  ;;  %v1445_v25 = vld [vmem:[#allocation4 + $0x74] sm:$0xf]  ;;  %v1075_v26 = vld [vmem:[#allocation4 + $0x78] sm:$0xf0]  ;;  %v1145_v28 = vld [vmem:[#allocation4 + $0x100] sm:$0xf]  ;;  %v1082_v35 = vor.u32 %v1448_v22, %v1081_v21  ;;  %v1330_v36 = vor.u32 %v1510_v24, %v1329_v23 }
  0x2d   :  { %v1464_v29 = vld [vmem:[#allocation4 + $0x104] sm:$0xf0]  ;;  %v1461_v30 = vld [vmem:[#allocation4 + $0xf4] sm:$0xf]  ;;  %v1139_v32 = vld [vmem:[#allocation4 + $0xf8] sm:$0xf0]  ;;  %v1078_v39 = vor.u32 %v1445_v25, %v1075_v26 }
  0x2e   :  { %649 = vmatpush.bf16.msra.mxu3 %v1234_v1  ;;  %608 = vmatpush.bf16.msra.mxu0 %v1034_v2  ;;  %v1209_v33 = vld [vmem:[#allocation4 + $0x180] sm:$0xf]  ;;  %v1480_v34 = vld [vmem:[#allocation4 + $0x184] sm:$0xf0]  ;;  %v1477_v37 = vld [vmem:[#allocation4 + $0x174] sm:$0xf]  ;;  %v1146_v40 = vor.u32 %v1464_v29, %v1145_v28  ;;  %v1142_v43 = vor.u32 %v1461_v30, %v1139_v32 }
  0x2f   :  { %622 = vmatpush.bf16.msra.mxu1 %v1098_v5  ;;  %v1203_v38 = vld [vmem:[#allocation4 + $0x178] sm:$0xf0]  ;;  %v1321_v41 = vld [vmem:[#allocation4 + $0x260] sm:$0xf]  ;;  %v1508_v42 = vld [vmem:[#allocation4 + $0x264] sm:$0xf0]  ;;  %v1210_v44 = vor.u32 %v1480_v34, %v1209_v33 }
  0x30   :  { %636 = vmatpush.bf16.msra.mxu2 %v1162_v6  ;;  %v1443_v45 = vld [vmem:[#allocation4 + $0x64] sm:$0xf]  ;;  %v1067_v46 = vld [vmem:[#allocation4 + $0x68] sm:$0xf0]  ;;  %v102_v47 = vld [vmem:[#allocation2] sm:$0xff]  ;;  %v1206_v48 = vor.u32 %v1477_v37, %v1203_v38  ;;  %v1322_v52 = vor.u32 %v1508_v42, %v1321_v41 }
  0x31   :  { %v1459_v49 = vld [vmem:[#allocation4 + $0xe4] sm:$0xf]  ;;  %v1131_v50 = vld [vmem:[#allocation4 + $0xe8] sm:$0xf0]  ;;  %v107_v51 = vld [vmem:[#allocation2 + $0x28] sm:$0xff]  ;;  %v1070_v57 = vor.u32 %v1443_v45, %v1067_v46 }
  0x32   :  { %650 = vmatpush.bf16.msra.mxu3 %v1226_v13  ;;  %609 = vmatpush.bf16.msra.mxu0 %v1026_v15  ;;  %v1313_v53 = vld [vmem:[#allocation4 + $0x250] sm:$0xf]  ;;  %v1475_v54 = vld [vmem:[#allocation4 + $0x164] sm:$0xf]  ;;  %v1195_v55 = vld [vmem:[#allocation4 + $0x168] sm:$0xf0]  ;;  %v1740_v56 = vpack.c.bf16 %v107_v51, %v102_v47  ;;  %v1134_v61 = vor.u32 %v1459_v49, %v1131_v50 }
  0x33   :  { %623 = vmatpush.bf16.msra.mxu1 %v1090_v19  ;;  %v1506_v58 = vld [vmem:[#allocation4 + $0x254] sm:$0xf0]  ;;  %v1441_v59 = vld [vmem:[#allocation4 + $0x54] sm:$0xf]  ;;  %v1059_v60 = vld [vmem:[#allocation4 + $0x58] sm:$0xf0]  ;;  %v1198_v1 = vor.u32 %v1475_v54, %v1195_v55 }
  0x34   :  { %637 = vmatpush.bf16.msra.mxu2 %v1154_v20  ;;  %v1457_v62 = vld [vmem:[#allocation4 + $0xd4] sm:$0xf]  ;;  %v104_v63 = vld [vmem:[#allocation2 + $0x10] sm:$0xff]  ;;  %v109_v0 = vld [vmem:[#allocation2 + $0x38] sm:$0xff]  ;;  %v1314_v6 = vor.u32 %v1506_v58, %v1313_v53  ;;  %v1062_v10 = vor.u32 %v1441_v59, %v1059_v60 }
  0x35   :  { %v1123_v2 = vld [vmem:[#allocation4 + $0xd8] sm:$0xf0]  ;;  %v1743_v3 = vpack.c.bf16 %v109_v0, %v104_v63  ;;  %v105_v4 = vld [vmem:[#allocation2 + $0x18] sm:$0xff]  ;;  %v110_v5 = vld [vmem:[#allocation2 + $0x40] sm:$0xff] }
  0x36   :  { %651 = vmatpush.bf16.msra.mxu3 %v1218_v27  ;;  %610 = vmatpush.bf16.msra.mxu0 %v1018_v31  ;;  %v1473_v7 = vld [vmem:[#allocation4 + $0x154] sm:$0xf]  ;;  %v1187_v8 = vld [vmem:[#allocation4 + $0x158] sm:$0xf0]  ;;  %v1745_v9 = vpack.c.bf16 %v110_v5, %v105_v4  ;;  %v1305_v11 = vld [vmem:[#allocation4 + $0x240] sm:$0xf]  ;;  %v1126_v14 = vor.u32 %v1457_v62, %v1123_v2 }
  0x37   :  { %624 = vmatpush.bf16.msra.mxu1 %v1082_v35  ;;  %v1504_v12 = vld [vmem:[#allocation4 + $0x244] sm:$0xf0]  ;;  %v1439_v13 = vld [vmem:[#allocation4 + $0x44] sm:$0xf]  ;;  %v1051_v15 = vld [vmem:[#allocation4 + $0x48] sm:$0xf0]  ;;  %v1190_v18 = vor.u32 %v1473_v7, %v1187_v8 }
  0x38   :  { %638 = vmatpush.bf16.msra.mxu2 %v1146_v40  ;;  %v103_v16 = vld [vmem:[#allocation2 + $0x8] sm:$0xff]  ;;  %v108_v17 = vld [vmem:[#allocation2 + $0x30] sm:$0xff]  ;;  %v1115_v20 = vld [vmem:[#allocation4 + $0xc8] sm:$0xf0]  ;;  %v1306_v22 = vor.u32 %v1504_v12, %v1305_v11  ;;  %v1054_v25 = vor.u32 %v1439_v13, %v1051_v15 }
  0x39   :  { %611 = vmatmul.bf16.vlgmr.msra.gmra.mxu0 %v1740_v56  ;;  %v1455_v19 = vld [vmem:[#allocation4 + $0xc4] sm:$0xf]  ;;  %v1749_v21 = vpack.c.bf16 %v108_v17, %v103_v16  ;;  %v1179_v24 = vld [vmem:[#allocation4 + $0x148] sm:$0xf0]  ;;  %v1297_v26 = vld [vmem:[#allocation4 + $0x230] sm:$0xf] }
  0x3a   :  { %659 = vmatpush.bf16.msrb.mxu0 %v1330_v36  ;;  %652 = vmatpush.bf16.msra.mxu3 %v1210_v44  ;;  %v1471_v23 = vld [vmem:[#allocation4 + $0x144] sm:$0xf]  ;;  %v1502_v27 = vld [vmem:[#allocation4 + $0x234] sm:$0xf0]  ;;  %v1118_v28 = vor.u32 %v1455_v19, %v1115_v20  ;;  %v1437_v29 = vld [vmem:[#allocation4 + $0x34] sm:$0xf] }
  0x3b   :  { %673 = vmatpush.bf16.msrb.mxu1 %v1078_v39  ;;  %639 = vmatmul.bf16.vlgmr.msra.gmra.mxu2 %v1743_v3  ;;  %v1043_v30 = vld [vmem:[#allocation4 + $0x38] sm:$0xf0]  ;;  %v1182_v31 = vor.u32 %v1471_v23, %v1179_v24  ;;  %v1453_v32 = vld [vmem:[#allocation4 + $0xb4] sm:$0xf]  ;;  %v1298_v34 = vor.u32 %v1502_v27, %v1297_v26  ;;  %v1289_v38 = vld [vmem:[#allocation4 + $0x220] sm:$0xf] }
  0x3c   :  { %687 = vmatpush.bf16.msrb.mxu2 %v1142_v43  ;;  %625 = vmatmul.bf16.vlgmr.msra.gmra.mxu1 %v1749_v21  ;;  %v1107_v33 = vld [vmem:[#allocation4 + $0xb8] sm:$0xf0]  ;;  %v1469_v35 = vld [vmem:[#allocation4 + $0x134] sm:$0xf]  ;;  %v1046_v37 = vor.u32 %v1437_v29, %v1043_v30  ;;  %v1500_v39 = vld [vmem:[#allocation4 + $0x224] sm:$0xf0] }
  0x3d   :  { %653 = vmatmul.bf16.vlgmr.msra.gmra.mxu3 %v1745_v9  ;;  %v1171_v36 = vld [vmem:[#allocation4 + $0x138] sm:$0xf0]  ;;  %v1110_v40 = vor.u32 %v1453_v32, %v1107_v33  ;;  %v1435_v41 = vld [vmem:[#allocation4 + $0x24] sm:$0xf]  ;;  %v1035_v42 = vld [vmem:[#allocation4 + $0x28] sm:$0xf0]  ;;  %v1290_v46 = vor.u32 %v1500_v39, %v1289_v38 }
  0x3e   :  { %701 = vmatpush.bf16.msrb.mxu3 %v1206_v48  ;;  %660 = vmatpush.bf16.msrb.mxu0 %v1322_v52  ;;  %v1174_v43 = vor.u32 %v1469_v35, %v1171_v36  ;;  %v1451_v44 = vld [vmem:[#allocation4 + $0xa4] sm:$0xf]  ;;  %v1099_v45 = vld [vmem:[#allocation4 + $0xa8] sm:$0xf0]  ;;  %v1038_v49 = vor.u32 %v1435_v41, %v1035_v42  ;;  %v1281_v50 = vld [vmem:[#allocation4 + $0x210] sm:$0xf] }
  0x3f   :  { %674 = vmatpush.bf16.msrb.mxu1 %v1070_v57  ;;  %v1467_v47 = vld [vmem:[#allocation4 + $0x124] sm:$0xf]  ;;  %v1163_v48 = vld [vmem:[#allocation4 + $0x128] sm:$0xf0]  ;;  %v1498_v51 = vld [vmem:[#allocation4 + $0x214] sm:$0xf0]  ;;  %v1102_v52 = vor.u32 %v1451_v44, %v1099_v45 }
  0x40   :  { %688 = vmatpush.bf16.msrb.mxu2 %v1134_v61  ;;  %v1433_v53 = vld [vmem:[#allocation4 + $0x14] sm:$0xf]  ;;  %v1027_v54 = vld [vmem:[#allocation4 + $0x18] sm:$0xf0]  ;;  %v1166_v57 = vor.u32 %v1467_v47, %v1163_v48  ;;  %v1273_v59 = vld [vmem:[#allocation4 + $0x200] sm:$0xf]  ;;  %v1282_v61 = vor.u32 %v1498_v51, %v1281_v50 }
  0x41   :  { %v1449_v55 = vld [vmem:[#allocation4 + $0x94] sm:$0xf]  ;;  %v1091_v58 = vld [vmem:[#allocation4 + $0x98] sm:$0xf0]  ;;  %v1496_v60 = vld [vmem:[#allocation4 + $0x204] sm:$0xf0] }
  0x42   :  { %702 = vmatpush.bf16.msrb.mxu3 %v1198_v1  ;;  %661 = vmatpush.bf16.msrb.mxu0 %v1314_v6  ;;  %v1431_v62 = vld [vmem:[#allocation4 + $0x4] sm:$0xf]  ;;  %v1465_v63 = vld [vmem:[#allocation4 + $0x114] sm:$0xf]  ;;  %v1155_v0 = vld [vmem:[#allocation4 + $0x118] sm:$0xf0]  ;;  %v1030_v1 = vor.u32 %v1433_v53, %v1027_v54  ;;  %v1094_v6 = vor.u32 %v1449_v55, %v1091_v58  ;;  %v1274_v15 = vor.u32 %v1496_v60, %v1273_v59 }
  0x43   :  { %675 = vmatpush.bf16.msrb.mxu1 %v1062_v10  ;;  %v1019_v2 = vld [vmem:[#allocation4 + $0x8] sm:$0xf0]  ;;  %v1493_v4 = vld [vmem:[#allocation4 + $0x1f4] sm:$0xf]  ;;  %v1267_v5 = vld [vmem:[#allocation4 + $0x1f8] sm:$0xf0]  ;;  %v1158_v11 = vor.u32 %v1465_v63, %v1155_v0 }
  0x44   :  { %689 = vmatpush.bf16.msrb.mxu2 %v1126_v14  ;;  %v1509_v7 = vld [vmem:[#allocation4 + $0x274] sm:$0xf]  ;;  %v1331_v8 = vld [vmem:[#allocation4 + $0x278] sm:$0xf0]  ;;  %v1447_v13 = vld [vmem:[#allocation4 + $0x84] sm:$0xf]  ;;  %v1270_v19 = vor.u32 %v1493_v4, %v1267_v5 }
  0x45   :  { %v106_v10 = vld [vmem:[#allocation2 + $0x20] sm:$0xff]  ;;  %v111_v12 = vld [vmem:[#allocation2 + $0x48] sm:$0xff]  ;;  %v1083_v14 = vld [vmem:[#allocation4 + $0x88] sm:$0xf0]  ;;  %v1334_v20 = vor.u32 %v1509_v7, %v1331_v8 }
  0x46   :  { %703 = vmatpush.bf16.msrb.mxu3 %v1190_v18  ;;  %662 = vmatpush.bf16.msrb.mxu0 %v1306_v22  ;;  %v1463_v16 = vld [vmem:[#allocation4 + $0x104] sm:$0xf]  ;;  %v1147_v17 = vld [vmem:[#allocation4 + $0x108] sm:$0xf0]  ;;  %v1022_v18 = vor.u32 %v1431_v62, %v1019_v2  ;;  %v1086_v22 = vor.u32 %v1447_v13, %v1083_v14  ;;  %v1251_v32 = vld [vmem:[#allocation4 + $0x1d8] sm:$0xf0] }
  0x47   :  { %676 = vmatpush.bf16.msrb.mxu1 %v1054_v25  ;;  %v1491_v23 = vld [vmem:[#allocation4 + $0x1e4] sm:$0xf]  ;;  %v1259_v24 = vld [vmem:[#allocation4 + $0x1e8] sm:$0xf0]  ;;  %v1752_v25 = vpack.c.bf16 %v111_v12, %v106_v10  ;;  %v1150_v26 = vor.u32 %v1463_v16, %v1147_v17  ;;  %v1505_v33 = vld [vmem:[#allocation4 + $0x254] sm:$0xf] }
  0x48   :  { %690 = vmatpush.bf16.msrb.mxu2 %v1118_v28  ;;  %v1507_v27 = vld [vmem:[#allocation4 + $0x264] sm:$0xf]  ;;  %v1323_v28 = vld [vmem:[#allocation4 + $0x268] sm:$0xf0]  ;;  %v1262_v29 = vor.u32 %v1491_v23, %v1259_v24  ;;  %v1235_v44 = vld [vmem:[#allocation4 + $0x1b8] sm:$0xf0] }
  0x49   :  { %v1326_v30 = vor.u32 %v1507_v27, %v1323_v28  ;;  %v1243_v38 = vld [vmem:[#allocation4 + $0x1c8] sm:$0xf0]  ;;  %v1503_v39 = vld [vmem:[#allocation4 + $0x244] sm:$0xf]  ;;  %v1501_v45 = vld [vmem:[#allocation4 + $0x234] sm:$0xf] }
  0x4a   :  { %704 = vmatpush.bf16.msrb.mxu3 %v1182_v31  ;;  %663 = vmatpush.bf16.msrb.mxu0 %v1298_v34  ;;  %v1489_v31 = vld [vmem:[#allocation4 + $0x1d4] sm:$0xf]  ;;  %v1315_v34 = vld [vmem:[#allocation4 + $0x258] sm:$0xf0]  ;;  %v1483_v47 = vld [vmem:[#allocation4 + $0x1a4] sm:$0xf] }
  0x4b   :  { %677 = vmatpush.bf16.msrb.mxu1 %v1046_v37  ;;  %v1254_v35 = vor.u32 %v1489_v31, %v1251_v32  ;;  %v1318_v36 = vor.u32 %v1505_v33, %v1315_v34  ;;  %v1487_v37 = vld [vmem:[#allocation4 + $0x1c4] sm:$0xf]  ;;  %v1227_v48 = vld [vmem:[#allocation4 + $0x1a8] sm:$0xf0]  ;;  %v1219_v53 = vld [vmem:[#allocation4 + $0x198] sm:$0xf0] }
  0x4c   :  { %691 = vmatpush.bf16.msrb.mxu2 %v1110_v40  ;;  %v1307_v40 = vld [vmem:[#allocation4 + $0x248] sm:$0xf0]  ;;  %v1246_v41 = vor.u32 %v1487_v37, %v1243_v38  ;;  %v1230_v50 = vor.u32 %v1483_v47, %v1227_v48  ;;  %v1497_v54 = vld [vmem:[#allocation4 + $0x214] sm:$0xf]  ;;  %v1283_v55 = vld [vmem:[#allocation4 + $0x218] sm:$0xf0] }
  0x4d   :  { %v1310_v42 = vor.u32 %v1503_v39, %v1307_v40  ;;  %v1286_v58 = vor.u32 %v1497_v54, %v1283_v55  ;;  %v1479_v59 = vld [vmem:[#allocation4 + $0x184] sm:$0xf]  ;;  %v1211_v60 = vld [vmem:[#allocation4 + $0x188] sm:$0xf0]  ;;  %v1517_v2 = vld [vmem:[#allocation7 + $0x30] sm:$0xff] }
  0x4e   :  { %705 = vmatpush.bf16.msrb.mxu3 %v1174_v43  ;;  %664 = vmatpush.bf16.msrb.mxu0 %v1290_v46  ;;  %v1485_v43 = vld [vmem:[#allocation4 + $0x1b4] sm:$0xf]  ;;  %v1275_v62 = vld [vmem:[#allocation4 + $0x208] sm:$0xf0]  ;;  %v1214_v63 = vor.u32 %v1479_v59, %v1211_v60  ;;  %v1515_v5 = vld [vmem:[#allocation7 + $0x20] sm:$0xff] }
  0x4f   :  { %678 = vmatpush.bf16.msrb.mxu1 %v1038_v49  ;;  %v1238_v46 = vor.u32 %v1485_v43, %v1235_v44  ;;  %v1291_v49 = vld [vmem:[#allocation4 + $0x228] sm:$0xf0]  ;;  %v1513_v7 = vld [vmem:[#allocation7 + $0x10] sm:$0xff]  ;;  %v197_v12 = vld [vmem:[#allocation6] sm:$0x3] }
  0x50   :  { %692 = vmatpush.bf16.msrb.mxu2 %v1102_v52  ;;  %v1481_v52 = vld [vmem:[#allocation4 + $0x194] sm:$0xf]  ;;  %v1516_v4 = vld [vmem:[#allocation7 + $0x28] sm:$0xff]  ;;  %v199_v13 = vperm.slane %v197_v12, 0  ;;  %v1522_v28 = vld [vmem:[#allocation7 + $0x58] sm:$0xff] }
  0x51   :  { %v1512_v8 = vld [vmem:[#allocation7 + $0x8] sm:$0xff]  ;;  %v1521_v33 = vld [vmem:[#allocation7 + $0x50] sm:$0xff] }
  0x52   :  { %706 = vmatpush.bf16.msrb.mxu3 %v1166_v57  ;;  %665 = vmatpush.bf16.msrb.mxu0 %v1282_v61  ;;  %v1222_v57 = vor.u32 %v1481_v52, %v1219_v53  ;;  %v1495_v61 = vld [vmem:[#allocation4 + $0x204] sm:$0xf]  ;;  %v1524_v17 = vld [vmem:[#allocation7 + $0x68] sm:$0xff] }
  0x53   :  { %679 = vmatpush.bf16.msrb.mxu1 %v1030_v1  ;;  %v1278_v0 = vor.u32 %v1495_v61, %v1275_v62  ;;  %v1518_v1 = vld [vmem:[#allocation7 + $0x38] sm:$0xff]  ;;  %v1520_v37 = vld [vmem:[#allocation7 + $0x48] sm:$0xff] }
  0x54   :  { %693 = vmatpush.bf16.msrb.mxu2 %v1094_v6  ;;  %v1514_v6 = vld [vmem:[#allocation7 + $0x18] sm:$0xff] }
  0x56   :  { %707 = vmatpush.bf16.msrb.mxu3 %v1158_v11  ;;  %666 = vmatpush.bf16.msrb.mxu0 %v1274_v15  ;;  %v1511_v11 = vld [vmem:[#allocation7] sm:$0xff]  ;;  %v1525_v15 = vld [vmem:[#allocation7 + $0x70] sm:$0xff] }
  0x57   :  { %680 = vmatpush.bf16.msrb.mxu1 %v1022_v18 }
  0x58   :  { %694 = vmatpush.bf16.msrb.mxu2 %v1086_v22  ;;  %v1523_v22 = vld [vmem:[#allocation7 + $0x60] sm:$0xff] }
  0x59   :  { %667 = vmatmul.bf16.vlgmr.msrb.gmra.mxu0 %v1752_v25 }
  0x5a   :  { %715 = vmatpush.bf16.msra.mxu0 %v1270_v19  ;;  %708 = vmatpush.bf16.msrb.mxu3 %v1150_v26 }
  0x5b   :  { %729 = vmatpush.bf16.msra.mxu1 %v1334_v20  ;;  %695 = vmatmul.bf16.vlgmr.msrb.gmra.mxu2 %v1749_v21 }
  0x5c   :  { %681 = vmatmul.bf16.vlgmr.msrb.gmra.mxu1 %v1740_v56  ;;  %v1299_v56 = vld [vmem:[#allocation4 + $0x238] sm:$0xf0]  ;;  %889 = vmatpush.bf16.msra.mxu2 %v1518_v1 }
  0x5d   :  { %709 = vmatmul.bf16.vlgmr.msrb.gmra.mxu3 %v1743_v3  ;;  %v1302_v21 = vor.u32 %v1501_v45, %v1299_v56  ;;  %v1499_v3 = vld [vmem:[#allocation4 + $0x224] sm:$0xf] }
  0x5e   :  { %716 = vmatpush.bf16.msra.mxu0 %v1262_v29  ;;  %v1294_v51 = vor.u32 %v1499_v3, %v1291_v49 }
  0x5f   :  { %730 = vmatpush.bf16.msra.mxu1 %v1326_v30 }
  0x60   :  { %890 = vmatpush.bf16.msra.mxu2 %v1517_v2 }
  0x62   :  { %717 = vmatpush.bf16.msra.mxu0 %v1254_v35 }
  0x63   :  { %731 = vmatpush.bf16.msra.mxu1 %v1318_v36 }
  0x64   :  { %891 = vmatpush.bf16.msra.mxu2 %v1516_v4 }
  0x66   :  { %718 = vmatpush.bf16.msra.mxu0 %v1246_v41 }
  0x67   :  { %732 = vmatpush.bf16.msra.mxu1 %v1310_v42  ;;  %v1519_v42 = vld [vmem:[#allocation7 + $0x40] sm:$0xff] }
  0x68   :  { %892 = vmatpush.bf16.msra.mxu2 %v1515_v5 }
  0x6a   :  { %719 = vmatpush.bf16.msra.mxu0 %v1238_v46  ;;  %v200_v46 = vperm.slane %v197_v12, 1  ;;  %v1530_v12 = vld [vmem:[#allocation9 + $0x18] sm:$0xff] }
  0x6b   :  { %733 = vmatpush.bf16.msra.mxu1 %v1302_v21 }
  0x6c   :  { %893 = vmatpush.bf16.msra.mxu2 %v1514_v6 }
  0x6e   :  { %720 = vmatpush.bf16.msra.mxu0 %v1230_v50 }
  0x6f   :  { %734 = vmatpush.bf16.msra.mxu1 %v1294_v51 }
  0x70   :  { %894 = vmatpush.bf16.msra.mxu2 %v1513_v7  ;;  %v1534_v7 = vld [vmem:[#allocation9 + $0x38] sm:$0xff] }
  0x72   :  { %721 = vmatpush.bf16.msra.mxu0 %v1222_v57 }
  0x73   :  { %735 = vmatpush.bf16.msra.mxu1 %v1286_v58 }
  0x74   :  { %895 = vmatpush.bf16.msra.mxu2 %v1512_v8  ;;  %v1533_v8 = vld [vmem:[#allocation9 + $0x30] sm:$0xff] }
  0x76   :  { %722 = vmatpush.bf16.msra.mxu0 %v1214_v63 }
  0x77   :  { %736 = vmatpush.bf16.msra.mxu1 %v1278_v0 }
  0x78   :  { %896 = vmatpush.bf16.msra.mxu2 %v1511_v11  ;;  %v1531_v11 = vld [vmem:[#allocation9 + $0x20] sm:$0xff] }
  0x79   :  { %723 = vmatmul.bf16.vlgmr.msra.gmra.mxu0 %v1745_v9  ;;  %v1526_v9 = vld [vmem:[#allocation7 + $0x78] sm:$0xff] }
  0x7a   :  { %737 = vmatmul.bf16.vlgmr.msra.gmra.mxu1 %v1752_v25  ;;  %903 = vmatpush.bf16.msra.mxu3 %v1526_v9  ;;  %v1529_v9 = vld [vmem:[#allocation9 + $0x10] sm:$0xff] }
  0x7b   :  { %992 = vmatpush.bf16.msrb.mxu0 %v1534_v7 }
  0x7e   :  { %904 = vmatpush.bf16.msra.mxu3 %v1525_v15 }
  0x7f   :  { %993 = vmatpush.bf16.msrb.mxu0 %v1533_v8 }
  0x82   :  { %905 = vmatpush.bf16.msra.mxu3 %v1524_v17 }
  0x86   :  { %906 = vmatpush.bf16.msra.mxu3 %v1523_v22 }
  0x8a   :  { %907 = vmatpush.bf16.msra.mxu3 %v1522_v28 }
  0x8e   :  { %908 = vmatpush.bf16.msra.mxu3 %v1521_v33 }
  0x92   :  { %909 = vmatpush.bf16.msra.mxu3 %v1520_v37 }
  0x96   :  { %910 = vmatpush.bf16.msra.mxu3 %v1519_v42 }
  0xb6   :  { %v612_v10 = vpop.f32.mrf.mxu0 }
  0xb7   :  { %v613_v16 = vadd.f32 %v612_v10, %v199_v13  ;;  %v1532_v10 = vld [vmem:[#allocation9 + $0x28] sm:$0xff] }
  0xb8   :  { %994 = vmatpush.bf16.msrb.mxu0 %v1532_v10 }
  0xb9   :  { %v626_v14 = vpop.f32.mrf.mxu1 }
  0xba   :  { %v627_v20 = vadd.f32 %v626_v14, %v613_v16  ;;  %v1527_v14 = vld [vmem:[#allocation9] sm:$0xff]  ;;  %v1546_v16 = vld [vmem:[%s1776_s4] ss:$0 sm:$0xff] }
  0xbc   :  { %995 = vmatpush.bf16.msrb.mxu0 %v1531_v11 }
  0xbe   :  { %v614_v18 = vpop.f32.mrf.mxu0  ;;  %v640_v19 = vpop.f32.mrf.mxu2 }
  0xbf   :  { %v615_v24 = vadd.f32 %v614_v18, %v199_v13  ;;  %v641_v26 = vadd.f32 %v640_v19, %v627_v20  ;;  %v1528_v13 = vld [vmem:[#allocation9 + $0x8] sm:$0xff] }
  0xc0   :  { %v654_v23 = vpop.f32.mrf.mxu3  ;;  %996 = vmatpush.bf16.msrb.mxu0 %v1530_v12 }
  0xc1   :  { %v628_v25 = vpop.f32.mrf.mxu1  ;;  %v655_v31 = vadd.f32 %v654_v23, %v641_v26 }
  0xc2   :  { %v629_v27 = vadd.f32 %v628_v25, %v615_v24 }
  0xc4   :  { %997 = vmatpush.bf16.msrb.mxu0 %v1529_v9 }
  0xc6   :  { %v642_v30 = vpop.f32.mrf.mxu2 }
  0xc7   :  { %v643_v32 = vadd.f32 %v642_v30, %v629_v27  ;;  %v1547_v30 = vld [vmem:[%s1778_s6] ss:$0 sm:$0xff] }
  0xc8   :  { %v656_v34 = vpop.f32.mrf.mxu3  ;;  %998 = vmatpush.bf16.msrb.mxu0 %v1528_v13 }
  0xc9   :  { %v657_v36 = vadd.f32 %v656_v34, %v643_v32 }
  0xcc   :  { %999 = vmatpush.bf16.msrb.mxu0 %v1527_v14 }
  0xd6   :  { %v668_v29 = vpop.f32.mrf.mxu0 }
  0xd7   :  { %v669_v35 = vadd.f32 %v668_v29, %v655_v31 }
  0xd9   :  { %v747_v39 = vmul.f32 0.01, %v669_v35  ;;  %vm743_vm0 = vcmp.gt.f32.partialorder %v669_v35, 0.0  ;;  %v682_v43 = vpop.f32.mrf.mxu1 }
  0xda   :  { %v683_v47 = vadd.f32 %v682_v43, %v200_v46 }
  0xdb   :  { %v751_v44 = vsel %vm743_vm0, %v669_v35, %v747_v39 }
  0xde   :  { %v670_v38 = vpop.f32.mrf.mxu0  ;;  %v696_v21 = vpop.f32.mrf.mxu2 }
  0xdf   :  { %v671_v40 = vadd.f32 %v670_v38, %v657_v36  ;;  %v697_v49 = vadd.f32 %v696_v21, %v683_v47 }
  0xe0   :  { %v710_v3 = vpop.f32.mrf.mxu3 }
  0xe1   :  { %vm745_vm1 = vcmp.gt.f32.partialorder %v671_v40, 0.0  ;;  %v749_v41 = vmul.f32 0.01, %v671_v40  ;;  %v684_v48 = vpop.f32.mrf.mxu1  ;;  %v711_v53 = vadd.f32 %v710_v3, %v697_v49 }
  0xe2   :  { %v685_v50 = vadd.f32 %v684_v48, %v200_v46 }
  0xe3   :  { %v753_v45 = vsel %vm745_vm1, %v671_v40, %v749_v41 }
  0xe4   :  { %v755_v56 = vpack.c.bf16 %v753_v45, %v751_v44 }
  0xe6   :  { %897 = vmatmul.bf16.vlgmr.msra.gmra.mxu2 %v755_v56  ;;  %v698_v51 = vpop.f32.mrf.mxu2 }
  0xe7   :  { %v699_v55 = vadd.f32 %v698_v51, %v685_v50 }
  0xe8   :  { %v712_v58 = vpop.f32.mrf.mxu3 }
  0xe9   :  { %v713_v59 = vadd.f32 %v712_v58, %v699_v55 }
  0xf6   :  { %v724_v52 = vpop.f32.mrf.mxu0 }
  0xf7   :  { %v738_v54 = vpop.f32.mrf.mxu1  ;;  %v725_v57 = vadd.f32 %v724_v52, %v711_v53 }
  0xf9   :  { %v739_v60 = vadd.f32 %v738_v54, %v725_v57 }
  0xfb   :  { %v748_v0 = vmul.f32 0.01, %v739_v60  ;;  %vm744_vm2 = vcmp.gt.f32.partialorder %v739_v60, 0.0 }
  0xfd   :  { %v752_v4 = vsel %vm744_vm2, %v739_v60, %v748_v0 }
  0xfe   :  { %v726_v61 = vpop.f32.mrf.mxu0 }
  0xff   :  { %v727_v62 = vadd.f32 %v726_v61, %v713_v59  ;;  %v740_v63 = vpop.f32.mrf.mxu1 }
 0x101   :  { %v741_v1 = vadd.f32 %v740_v63, %v727_v62 }
 0x103   :  { %vm746_vm3 = vcmp.gt.f32.partialorder %v741_v1, 0.0  ;;  %v750_v2 = vmul.f32 0.01, %v741_v1 }
 0x105   :  { %v754_v5 = vsel %vm746_vm3, %v741_v1, %v750_v2 }
 0x106   :  { %v756_v6 = vpack.c.bf16 %v754_v5, %v752_v4 }
 0x108   :  { %911 = vmatmul.bf16.vlgmr.msra.gmra.mxu3 %v756_v6 }
 0x169   :  { %v898_v15 = vpop.f32.mrf.mxu2 }
 0x16a   :  { %v899_v18 = vadd.f32 %v1546_v16, %v898_v15 }
 0x171   :  { %v900_v19 = vpop.f32.mrf.mxu2 }
 0x172   :  { %v901_v22 = vadd.f32 %v1546_v16, %v900_v19 }
 0x18b   :  { %v912_v17 = vpop.f32.mrf.mxu3 }
 0x18c   :  { %v913_v20 = vadd.f32 %v912_v17, %v899_v18 }
 0x18e   :  { %v919_v24 = vmul.f32 0.01, %v913_v20  ;;  %vm917_vm4 = vcmp.gt.f32.partialorder %v913_v20, 0.0 }
 0x190   :  { %v921_v27 = vsel %vm917_vm4, %v913_v20, %v919_v24 }
 0x193   :  { %v914_v23 = vpop.f32.mrf.mxu3 }
 0x194   :  { %v915_v25 = vadd.f32 %v914_v23, %v901_v22 }
 0x196   :  { %vm918_vm5 = vcmp.gt.f32.partialorder %v915_v25, 0.0  ;;  %v920_v26 = vmul.f32 0.01, %v915_v25 }
 0x198   :  { %v922_v28 = vsel %vm918_vm5, %v915_v25, %v920_v26 }
 0x199   :  { %v923_v29 = vpack.c.bf16 %v922_v28, %v921_v27 }
 0x19b   :  { %1000 = vmatmul.bf16.vlgmr.msrb.gmra.mxu0 %v923_v29 }
 0x218   :  { %v1001_v31 = vpop.f32.mrf.mxu0 }
 0x219   :  { %v1002_v32 = vadd.f32 %v1547_v30, %v1001_v31 }
 0x21b   :  { %1006 = vst [vmem:[%s1779_s7] sm:$0xff] %v1002_v32 }
 0x220   :  { %v1003_v33 = vpop.f32.mrf.mxu0 }
 0x221   :  { %v1004_v34 = vadd.f32 %v1547_v30, %v1003_v33 }
 0x223   :  { %1007 = vst [vmem:[%s1779_s7 + $0x8] sm:$0xff] %v1004_v34 }
 0x224   :  { %1012 = vsyncpa [#allocation3], 1 }
 0x225   :  { %1013 = vsyncpa [#allocation5], 1 }
 0x226   :  { %1014 = vsyncpa [#allocation8], 1 }

</bundles_post_ra>
